<compile_context>
chip_gen: v7x
topology: tpu7x:2x2x1
jax: 0.10.0
libtpu: 0.0.40
codegen_flags: <defaults>
</compile_context>

<pallas_src>
import functools

import jax
import jax.numpy as jnp
from jax.experimental import pallas as pl
from jax.experimental.pallas import tpu as pltpu


# ----------------------------- Pallas kernel ------------------------------ #

def grapher_kernel(x_ref, w1_ref, b1_ref, wg_ref, bg_ref, w2_ref, b2_ref,
                   out_ref, y_ref, xj_ref, *, H, W, C, K, approx_gelu):
    """One batch-block per grid step.

    x_ref block: (Bb*H, W*C) f32, lane-dense (row = one (b, h) line of pixels,
    lanes = W pixels x C channels).  Weights are block-diagonal / tiled so the
    1x1 convs are plain 2-D matmuls in this layout.
    """
    R = x_ref.shape[0]                 # Bb * H rows in this block
    Bb = R // H
    WC = W * C
    mxu = w1_ref.dtype                 # bf16 (or f32 fallback)

    # fc1 = Conv2d(C,C,1) + folded BN: one lane-dense MXU matmul.
    y = jnp.dot(x_ref[...].astype(mxu), w1_ref[...],
                preferred_element_type=jnp.float32) + b1_ref[...]

    # ---- MRConv4d max-relative aggregation (single roll per hop) ----------
    x_j = jnp.zeros_like(y)

    if Bb > 1:
        # image-boundary fix-up predicate, hoisted once (only needed when the
        # block holds more than one image along the sublane axis)
        h_idx = jax.lax.broadcasted_iota(jnp.int32, (R, 1), 0) % H

    for i in range(K, H, K):           # vertical hops: sublane rotation
        if Bb == 1:
            rolled = pltpu.roll(y, i, axis=0)
        else:
            rolled = jnp.where(h_idx >= i,
                               pltpu.roll(y, i, axis=0),
                               pltpu.roll(y, R - (H - i), axis=0))
        x_j = jnp.maximum(x_j, y - rolled)

    for i in range(K, W, K):           # horizontal hops: pure lane rotation
        x_j = jnp.maximum(x_j, y - pltpu.roll(y, i * C, axis=1))

    # graphs = cat([y, x_j], channel): two lane-dense slabs (wrapper concats
    # while restoring NCHW) -> unmasked full-row stores, contiguous DMA.
    y_ref[...] = y.astype(y_ref.dtype)
    xj_ref[...] = x_j.astype(xj_ref.dtype)

    # graph_conv.nn = Conv2d(2C,2C,1) + folded BN + GELU, as ONE merged matmul
    # (the block-diagonal weight carries the per-pixel structure).
    g = jnp.concatenate([y.astype(mxu), x_j.astype(mxu)], axis=-1)   # (R, 2*WC)
    z = jnp.dot(g, wg_ref[...], preferred_element_type=jnp.float32) + bg_ref[...]
    if approx_gelu:
        z = jax.nn.gelu(z, approximate=True)        # EUP tanh path (opt-in)
    else:
        # exact (erf) GELU in f32 -- matches PyTorch nn.GELU() default
        z = 0.5 * z * (1.0 + jax.lax.erf(z * jnp.float32(0.7071067811865476)))

    # fc2 = Conv2d(2C,C,1) + folded BN; DropPath == Identity; residual add.
    # x_ref is re-read here instead of kept live across the body (vreg pressure).
    o = jnp.dot(z.astype(mxu), w2_ref[...],
                preferred_element_type=jnp.float32) + b2_ref[...]
    out_ref[...] = (o + x_ref[...]).astype(out_ref.dtype)

    del WC  # (kept for readability of the layout comment)


# --------------------------- blocking heuristics --------------------------- #

def _tpu_vmem_bytes():
    try:
        info = pltpu.get_tpu_info()
        v = getattr(info, "vmem_capacity_bytes", None)
        if v:
            return int(v)
    except Exception:
        pass
    return 64 * (1 << 20)        # conservative (v7x-sized) fallback


def _pick_batch_block(B, H, W, C, vmem_bytes):
    """Images per grid step, generation-aware.

    v7x-like (<=96 MiB VMEM, 2 TensorCores): keep >=2 grid steps so the
    "parallel" batch axis can be sharded across cores.  v5e/v6e (128 MiB VMEM,
    1 core): merge batches toward ~1024 rows/step to amortize the ~0.35us
    per-step overhead, capped by a VMEM budget.
    """
    rows_per_img = H * W
    two_core = vmem_bytes <= 96 * (1 << 20)
    target_rows = 128 if two_core else 1024
    bb = max(1, min(B, -(-target_rows // rows_per_img)))      # ceil
    # cap the double-buffered activation footprint (x + out + y + x_j blocks)
    per_img = 4 * rows_per_img * C * 4
    budget = vmem_bytes // 8
    while bb > 1 and 2 * bb * per_img > budget:
        bb -= 1
    if two_core and B >= 2:
        bb = min(bb, B // 2)               # >=2 grid steps, one per TensorCore
    while B % bb:                          # make bb divide B evenly
        bb -= 1
    if (bb * H) % 8 and bb * H != B * H:   # (8,128) block constraint fallback
        bb = B
    return bb


def _vmem_limit_bytes(bb, H, W, C, vmem_bytes, mxu_itemsize):
    wc = W * C
    weight = (wc * wc + (2 * wc) * (2 * wc) + (2 * wc) * wc) * mxu_itemsize
    blocks = 4 * bb * H * wc * 4           # x + out + y + x_j blocks (f32)
    live = 8 * bb * H * wc * 4             # y / x_j / g / z intermediates
    need = 2 * (weight + blocks) + live + (2 << 20)
    return int(min(vmem_bytes * 3 // 4, max(32 << 20, 2 * need)))


# ------------------------------- wrapper ----------------------------------- #

def grapher_forward(x_nchw, params, K=2, mxu_dtype=jnp.bfloat16,
                    approx_gelu=False, graphs_dtype=None):
    """params = (w1, b1, wg, bg, w2, b2), BN already folded (matmul form).

    mxu_dtype:    matmul operand dtype (bf16 default; pass jnp.float32 for an
                  exact-precision fallback).
    graphs_dtype: optionally emit `graphs` in bf16 to halve its HBM writeback
                  (defaults to the input dtype for semantic parity).
    """
    w1, b1, wg, bg, w2, b2 = params
    B, C, H, W = x_nchw.shape
    WC = W * C
    gdt = x_nchw.dtype if graphs_dtype is None else graphs_dtype

    # NCHW -> lane-dense (B*H, W*C)
    x = jnp.transpose(x_nchw, (0, 2, 3, 1)).reshape(B * H, WC)

    # Block-diagonal / tiled weights (built once, outside the kernel).
    eye_w = jnp.eye(W, dtype=jnp.float32)
    w1d = jnp.kron(eye_w, w1).astype(mxu_dtype)                    # (WC, WC)
    wgd = jnp.concatenate([jnp.kron(eye_w, wg[:C]),
                           jnp.kron(eye_w, wg[C:])],
                          axis=0).astype(mxu_dtype)                # (2WC, 2WC)
    w2d = jnp.kron(eye_w, w2).astype(mxu_dtype)                    # (2WC, WC)
    b1d = jnp.tile(b1, (1, W))                                     # (1, WC)
    bgd = jnp.tile(bg, (1, W))                                     # (1, 2WC)
    b2d = jnp.tile(b2, (1, W))                                     # (1, WC)

    vmem_bytes = _tpu_vmem_bytes()
    bb = _pick_batch_block(B, H, W, C, vmem_bytes)
    vmem_limit = _vmem_limit_bytes(bb, H, W, C, vmem_bytes,
                                   jnp.dtype(mxu_dtype).itemsize)

    kernel = functools.partial(grapher_kernel, H=H, W=W, C=C, K=K,
                               approx_gelu=approx_gelu)

    rows_blk = bb * H
    out_d, y_d, xj_d = pl.pallas_call(
        kernel,
        out_shape=(jax.ShapeDtypeStruct((B * H, WC), x_nchw.dtype),
                   jax.ShapeDtypeStruct((B * H, WC), gdt),
                   jax.ShapeDtypeStruct((B * H, WC), gdt)),
        grid_spec=pltpu.PrefetchScalarGridSpec(
            num_scalar_prefetch=0,
            grid=(B // bb,),
            in_specs=[
                pl.BlockSpec((rows_blk, WC), lambda b: (b, 0)),
                pl.BlockSpec((WC, WC), lambda b: (0, 0)),
                pl.BlockSpec((1, WC), lambda b: (0, 0)),
                pl.BlockSpec((2 * WC, 2 * WC), lambda b: (0, 0)),
                pl.BlockSpec((1, 2 * WC), lambda b: (0, 0)),
                pl.BlockSpec((2 * WC, WC), lambda b: (0, 0)),
                pl.BlockSpec((1, WC), lambda b: (0, 0)),
            ],
            out_specs=[
                pl.BlockSpec((rows_blk, WC), lambda b: (b, 0)),
                pl.BlockSpec((rows_blk, WC), lambda b: (b, 0)),
                pl.BlockSpec((rows_blk, WC), lambda b: (b, 0)),
            ],
        ),
        compiler_params=pltpu.CompilerParams(
            dimension_semantics=("parallel",),
            vmem_limit_bytes=vmem_limit),
    )(x, w1d, b1d, wgd, bgd, w2d, b2d)

    # back to PyTorch NCHW conventions
    out = jnp.transpose(out_d.reshape(B, H, W, C), (0, 3, 1, 2))
    y_n = jnp.transpose(y_d.reshape(B, H, W, C), (0, 3, 1, 2))
    xj_n = jnp.transpose(xj_d.reshape(B, H, W, C), (0, 3, 1, 2))
    graphs = jnp.concatenate([y_n, xj_n], axis=1)
    return out, graphs


# ------------------------- parameter construction -------------------------- #

def _fold_bn(w, b, gamma, beta, mean, var, eps=1e-5):
    """Fold eval-mode BN into a (C_in, C_out) matmul weight + (1, C_out) bias."""
    scale = gamma / jnp.sqrt(var + eps)
    w_f = w * scale[None, :]
    b_f = (b - mean) * scale + beta
    return w_f.astype(jnp.float32), b_f[None, :].astype(jnp.float32)


def init_params(key, C):
    """Deterministic synthetic parameters matching the PyTorch module shapes."""
    ks = jax.random.split(key, 12)

    def conv_w(k, cin, cout):  # Conv2d(cin, cout, 1) weight, stored as (cin, cout)
        bound = 1.0 / jnp.sqrt(cin)
        return jax.random.uniform(k, (cin, cout), jnp.float32, -bound, bound)

    def conv_b(k, cin, cout):
        bound = 1.0 / jnp.sqrt(cin)
        return jax.random.uniform(k, (cout,), jnp.float32, -bound, bound)

    def bn(k, c):  # gamma, beta, running_mean, running_var
        g = 1.0 + 0.1 * jax.random.normal(k, (c,), jnp.float32)
        b = 0.1 * jax.random.normal(jax.random.fold_in(k, 1), (c,), jnp.float32)
        return g, b, jnp.zeros((c,), jnp.float32), jnp.ones((c,), jnp.float32)

    # fc1: Conv2d(C, C, 1) + BN(C)
    w1, b1 = _fold_bn(conv_w(ks[0], C, C), conv_b(ks[1], C, C), *bn(ks[2], C))
    # graph_conv.nn: Conv2d(2C, 2C, 1) + BN(2C)
    wg, bg = _fold_bn(conv_w(ks[3], 2 * C, 2 * C), conv_b(ks[4], 2 * C, 2 * C),
                      *bn(ks[5], 2 * C))
    # fc2: Conv2d(2C, C, 1) + BN(C)
    w2, b2 = _fold_bn(conv_w(ks[6], 2 * C, C), conv_b(ks[7], 2 * C, C),
                      *bn(ks[8], C))
    return (w1, b1, wg, bg, w2, b2)


# --------------------------- pure-JAX reference ----------------------------- #

def grapher_reference(x_nchw, params, K=2):
    w1, b1, wg, bg, w2, b2 = params
    x = jnp.transpose(x_nchw, (0, 2, 3, 1))
    B, H, W, C = x.shape
    y = jnp.einsum('bhwc,cd->bhwd', x, w1) + b1
    x_j = jnp.zeros_like(y)
    for i in range(K, H, K):
        x_c = y - jnp.concatenate([y[:, H - i:], y[:, :H - i]], axis=1)
        x_j = jnp.maximum(x_j, x_c)
    for i in range(K, W, K):
        x_r = y - jnp.concatenate([y[:, :, W - i:], y[:, :, :W - i]], axis=2)
        x_j = jnp.maximum(x_j, x_r)
    g = jnp.concatenate([y, x_j], axis=-1)
    z = jnp.einsum('bhwc,cd->bhwd', g, wg) + bg
    z = 0.5 * z * (1.0 + jax.lax.erf(z / jnp.sqrt(2.0)))
    o = jnp.einsum('bhwc,cd->bhwd', z, w2) + b2
    out = o + x
    return (jnp.transpose(out, (0, 3, 1, 2)), jnp.transpose(g, (0, 3, 1, 2)))


# ---------------------------------- main ------------------------------------ #

if __name__ == "__main__":
    B, C, H, W, K = 2, 32, 8, 8, 2

    key = jax.random.PRNGKey(0)
    kx, kp = jax.random.split(key)
    x = jax.random.normal(kx, (B, C, H, W), jnp.float32)   # PyTorch NCHW input
    params = init_params(kp, C)

    fwd = jax.jit(functools.partial(grapher_forward, K=K))
    out, graphs = fwd(x, params)
    out = jax.block_until_ready(out)
    graphs = jax.block_until_ready(graphs)

    ref_out, ref_graphs = grapher_reference(x, params, K=K)
    assert out.shape == (B, C, H, W) and graphs.shape == (B, 2 * C, H, W)
    # bf16 MXU operands -> loosened tolerance vs. the f32 reference
    assert jnp.allclose(out, ref_out, atol=5e-2, rtol=5e-2)
    assert jnp.allclose(graphs, ref_graphs, atol=5e-2, rtol=5e-2)

    print("KERNEL_OK")
</pallas_src>

<mosaic_0001>
module attributes {stable_mosaic.version = 11 : i64} {
  func.func @grapher_kernel(%arg0: i32, %arg1: memref<8x256xf32, #tpu.memory_space<vmem>>, %arg2: memref<256x256xbf16, #tpu.memory_space<vmem>>, %arg3: memref<1x256xf32, #tpu.memory_space<vmem>>, %arg4: memref<512x512xbf16, #tpu.memory_space<vmem>>, %arg5: memref<1x512xf32, #tpu.memory_space<vmem>>, %arg6: memref<512x256xbf16, #tpu.memory_space<vmem>>, %arg7: memref<1x256xf32, #tpu.memory_space<vmem>>, %arg8: memref<8x256xf32, #tpu.memory_space<vmem>>, %arg9: memref<8x256xf32, #tpu.memory_space<vmem>>, %arg10: memref<8x256xf32, #tpu.memory_space<vmem>>) attributes {dimension_semantics = [#tpu.dimension_semantics<parallel>], iteration_bounds = array<i64: 2>, scalar_prefetch = 0 : i64, scratch_operands = 0 : i64, tpu.core_type = #tpu.core_type<tc>, window_params = [{transform_indices = @transform_0, window_bounds = array<i64: 8, 256>}, {pipeline_mode = #tpu.pipeline_mode<synchronous>, transform_indices = @transform_1, window_bounds = array<i64: 256, 256>}, {pipeline_mode = #tpu.pipeline_mode<synchronous>, transform_indices = @transform_2, window_bounds = array<i64: 1, 256>}, {pipeline_mode = #tpu.pipeline_mode<synchronous>, transform_indices = @transform_3, window_bounds = array<i64: 512, 512>}, {pipeline_mode = #tpu.pipeline_mode<synchronous>, transform_indices = @transform_4, window_bounds = array<i64: 1, 512>}, {pipeline_mode = #tpu.pipeline_mode<synchronous>, transform_indices = @transform_5, window_bounds = array<i64: 512, 256>}, {pipeline_mode = #tpu.pipeline_mode<synchronous>, transform_indices = @transform_6, window_bounds = array<i64: 1, 256>}, {transform_indices = @transform_7, window_bounds = array<i64: 8, 256>}, {transform_indices = @transform_8, window_bounds = array<i64: 8, 256>}, {transform_indices = @transform_9, window_bounds = array<i64: 8, 256>}]} {
    %c0 = arith.constant 0 : index
    %c0_0 = arith.constant 0 : index
    %0 = vector.load %arg1[%c0, %c0_0] : memref<8x256xf32, #tpu.memory_space<vmem>>, vector<8x256xf32>
    %1 = arith.truncf %0 : vector<8x256xf32> to vector<8x256xbf16>
    %c0_1 = arith.constant 0 : index
    %c0_2 = arith.constant 0 : index
    %2 = vector.load %arg2[%c0_1, %c0_2] : memref<256x256xbf16, #tpu.memory_space<vmem>>, vector<256x256xbf16>
    %cst = arith.constant dense<0.000000e+00> : vector<8x256xf32>
    %3 = tpu.matmul %1, %2, %cst {dimension_numbers = #tpu.dot_dimension_numbers<[1], [0], [0], [1], [0, 0, 1, 1], [], []>} : vector<8x256xbf16>, vector<256x256xbf16>, vector<8x256xf32> -> vector<8x256xf32>
    %c0_3 = arith.constant 0 : index
    %c0_4 = arith.constant 0 : index
    %4 = vector.load %arg3[%c0_3, %c0_4] : memref<1x256xf32, #tpu.memory_space<vmem>>, vector<1x256xf32>
    %5 = vector.broadcast %4 : vector<1x256xf32> to vector<8x256xf32>
    %6 = arith.addf %3, %5 : vector<8x256xf32>
    %cst_5 = arith.constant 0.000000e+00 : f32
    %7 = vector.broadcast %cst_5 : f32 to vector<8x256xf32>
    %c2_i32 = arith.constant 2 : i32
    %8 = tpu.dynamic_rotate %6 by %c2_i32 dim 0 : vector<8x256xf32>, i32 -> vector<8x256xf32>
    %9 = arith.subf %6, %8 : vector<8x256xf32>
    %10 = arith.maximumf %7, %9 : vector<8x256xf32>
    %c4_i32 = arith.constant 4 : i32
    %11 = tpu.dynamic_rotate %6 by %c4_i32 dim 0 : vector<8x256xf32>, i32 -> vector<8x256xf32>
    %12 = arith.subf %6, %11 : vector<8x256xf32>
    %13 = arith.maximumf %10, %12 : vector<8x256xf32>
    %c6_i32 = arith.constant 6 : i32
    %14 = tpu.dynamic_rotate %6 by %c6_i32 dim 0 : vector<8x256xf32>, i32 -> vector<8x256xf32>
    %15 = arith.subf %6, %14 : vector<8x256xf32>
    %16 = arith.maximumf %13, %15 : vector<8x256xf32>
    %c64_i32 = arith.constant 64 : i32
    %17 = tpu.dynamic_rotate %6 by %c64_i32 dim 1 : vector<8x256xf32>, i32 -> vector<8x256xf32>
    %18 = arith.subf %6, %17 : vector<8x256xf32>
    %19 = arith.maximumf %16, %18 : vector<8x256xf32>
    %c128_i32 = arith.constant 128 : i32
    %20 = tpu.dynamic_rotate %6 by %c128_i32 dim 1 : vector<8x256xf32>, i32 -> vector<8x256xf32>
    %21 = arith.subf %6, %20 : vector<8x256xf32>
    %22 = arith.maximumf %19, %21 : vector<8x256xf32>
    %c192_i32 = arith.constant 192 : i32
    %23 = tpu.dynamic_rotate %6 by %c192_i32 dim 1 : vector<8x256xf32>, i32 -> vector<8x256xf32>
    %24 = arith.subf %6, %23 : vector<8x256xf32>
    %25 = arith.maximumf %22, %24 : vector<8x256xf32>
    %c0_6 = arith.constant 0 : index
    %c0_7 = arith.constant 0 : index
    %26 = vector.load %arg9[%c0_6, %c0_7] : memref<8x256xf32, #tpu.memory_space<vmem>>, vector<8x256xf32>
    tpu.vector_store %arg9[%c0_6, %c0_7], %6 {strides = array<i32>} : memref<8x256xf32, #tpu.memory_space<vmem>>, vector<8x256xf32>,
    %c0_8 = arith.constant 0 : index
    %c0_9 = arith.constant 0 : index
    %27 = vector.load %arg10[%c0_8, %c0_9] : memref<8x256xf32, #tpu.memory_space<vmem>>, vector<8x256xf32>
    tpu.vector_store %arg10[%c0_8, %c0_9], %25 {strides = array<i32>} : memref<8x256xf32, #tpu.memory_space<vmem>>, vector<8x256xf32>,
    %28 = arith.truncf %6 : vector<8x256xf32> to vector<8x256xbf16>
    %29 = arith.truncf %25 : vector<8x256xf32> to vector<8x256xbf16>
    %30 = tpu.concatenate %28, %29 in 1 : vector<8x256xbf16>, vector<8x256xbf16> -> vector<8x512xbf16>
    %c0_10 = arith.constant 0 : index
    %c0_11 = arith.constant 0 : index
    %31 = vector.load %arg4[%c0_10, %c0_11] : memref<512x512xbf16, #tpu.memory_space<vmem>>, vector<512x512xbf16>
    %cst_12 = arith.constant dense<0.000000e+00> : vector<8x512xf32>
    %32 = tpu.matmul %30, %31, %cst_12 {dimension_numbers = #tpu.dot_dimension_numbers<[1], [0], [0], [1], [0, 0, 1, 1], [], []>} : vector<8x512xbf16>, vector<512x512xbf16>, vector<8x512xf32> -> vector<8x512xf32>
    %c0_13 = arith.constant 0 : index
    %c0_14 = arith.constant 0 : index
    %33 = vector.load %arg5[%c0_13, %c0_14] : memref<1x512xf32, #tpu.memory_space<vmem>>, vector<1x512xf32>
    %34 = vector.broadcast %33 : vector<1x512xf32> to vector<8x512xf32>
    %35 = arith.addf %32, %34 : vector<8x512xf32>
    %cst_15 = arith.constant 5.000000e-01 : f32
    %36 = vector.broadcast %cst_15 : f32 to vector<8x512xf32>
    %37 = arith.mulf %36, %35 : vector<8x512xf32>
    %cst_16 = arith.constant 0.707106769 : f32
    %38 = vector.broadcast %cst_16 : f32 to vector<8x512xf32>
    %39 = arith.mulf %35, %38 : vector<8x512xf32>
    %40 = math.erf %39 : vector<8x512xf32>
    %cst_17 = arith.constant 1.000000e+00 : f32
    %41 = vector.broadcast %cst_17 : f32 to vector<8x512xf32>
    %42 = arith.addf %41, %40 : vector<8x512xf32>
    %43 = arith.mulf %37, %42 : vector<8x512xf32>
    %44 = arith.truncf %43 : vector<8x512xf32> to vector<8x512xbf16>
    %c0_18 = arith.constant 0 : index
    %c0_19 = arith.constant 0 : index
    %45 = vector.load %arg6[%c0_18, %c0_19] : memref<512x256xbf16, #tpu.memory_space<vmem>>, vector<512x256xbf16>
    %cst_20 = arith.constant dense<0.000000e+00> : vector<8x256xf32>
    %46 = tpu.matmul %44, %45, %cst_20 {dimension_numbers = #tpu.dot_dimension_numbers<[1], [0], [0], [1], [0, 0, 1, 1], [], []>} : vector<8x512xbf16>, vector<512x256xbf16>, vector<8x256xf32> -> vector<8x256xf32>
    %c0_21 = arith.constant 0 : index
    %c0_22 = arith.constant 0 : index
    %47 = vector.load %arg7[%c0_21, %c0_22] : memref<1x256xf32, #tpu.memory_space<vmem>>, vector<1x256xf32>
    %48 = vector.broadcast %47 : vector<1x256xf32> to vector<8x256xf32>
    %49 = arith.addf %46, %48 : vector<8x256xf32>
    %c0_23 = arith.constant 0 : index
    %c0_24 = arith.constant 0 : index
    %50 = vector.load %arg1[%c0_23, %c0_24] : memref<8x256xf32, #tpu.memory_space<vmem>>, vector<8x256xf32>
    %51 = arith.addf %49, %50 : vector<8x256xf32>
    %c0_25 = arith.constant 0 : index
    %c0_26 = arith.constant 0 : index
    %52 = vector.load %arg8[%c0_25, %c0_26] : memref<8x256xf32, #tpu.memory_space<vmem>>, vector<8x256xf32>
    tpu.vector_store %arg8[%c0_25, %c0_26], %51 {strides = array<i32>} : memref<8x256xf32, #tpu.memory_space<vmem>>, vector<8x256xf32>,
    return
  }
  func.func @transform_0(%arg0: i32) -> (i32, i32) {
    %c0_i32 = arith.constant 0 : i32
    %c0_i32_0 = arith.constant 0 : i32
    return %arg0, %c0_i32 : i32, i32
  }
  func.func @transform_1(%arg0: i32) -> (i32, i32) {
    %c0_i32 = arith.constant 0 : i32
    %c0_i32_0 = arith.constant 0 : i32
    %c0_i32_1 = arith.constant 0 : i32
    return %c0_i32, %c0_i32_0 : i32, i32
  }
  func.func @transform_2(%arg0: i32) -> (i32, i32) {
    %c0_i32 = arith.constant 0 : i32
    %c0_i32_0 = arith.constant 0 : i32
    %c0_i32_1 = arith.constant 0 : i32
    return %c0_i32, %c0_i32_0 : i32, i32
  }
  func.func @transform_3(%arg0: i32) -> (i32, i32) {
    %c0_i32 = arith.constant 0 : i32
    %c0_i32_0 = arith.constant 0 : i32
    %c0_i32_1 = arith.constant 0 : i32
    return %c0_i32, %c0_i32_0 : i32, i32
  }
  func.func @transform_4(%arg0: i32) -> (i32, i32) {
    %c0_i32 = arith.constant 0 : i32
    %c0_i32_0 = arith.constant 0 : i32
    %c0_i32_1 = arith.constant 0 : i32
    return %c0_i32, %c0_i32_0 : i32, i32
  }
  func.func @transform_5(%arg0: i32) -> (i32, i32) {
    %c0_i32 = arith.constant 0 : i32
    %c0_i32_0 = arith.constant 0 : i32
    %c0_i32_1 = arith.constant 0 : i32
    return %c0_i32, %c0_i32_0 : i32, i32
  }
  func.func @transform_6(%arg0: i32) -> (i32, i32) {
    %c0_i32 = arith.constant 0 : i32
    %c0_i32_0 = arith.constant 0 : i32
    %c0_i32_1 = arith.constant 0 : i32
    return %c0_i32, %c0_i32_0 : i32, i32
  }
  func.func @transform_7(%arg0: i32) -> (i32, i32) {
    %c0_i32 = arith.constant 0 : i32
    %c0_i32_0 = arith.constant 0 : i32
    return %arg0, %c0_i32 : i32, i32
  }
  func.func @transform_8(%arg0: i32) -> (i32, i32) {
    %c0_i32 = arith.constant 0 : i32
    %c0_i32_0 = arith.constant 0 : i32
    return %arg0, %c0_i32 : i32, i32
  }
  func.func @transform_9(%arg0: i32) -> (i32, i32) {
    %c0_i32 = arith.constant 0 : i32
    %c0_i32_0 = arith.constant 0 : i32
    return %arg0, %c0_i32 : i32, i32
  }
}

</mosaic_0001>

<bundles_post_ra>
// kernel: grapher_forward.1
= control target key start
LH: loop header
LB: loop body
LE: loop exit
PB: predicated region body
PF: predicated region fallthrough
CT: control target
= control target key end

     0   :  { %s2904_s30 = smov 0   ;;  %s3670_s0 = inlined_call_operand.vmem [shape: f32[16,256], index: 0, kind: input, shape index: {}]   ;;  %s3671_s1 = inlined_call_operand.vmem [shape: bf16[256,256], index: 1, kind: input, shape index: {}]   ;;  %s3672_s2 = inlined_call_operand.vmem [shape: f32[1,256], index: 2, kind: input, shape index: {}]   ;;  %s3673_s3 = inlined_call_operand.vmem [shape: bf16[512,512], index: 3, kind: input, shape index: {}]   ;;  %s3674_s4 = inlined_call_operand.vmem [shape: f32[1,512], index: 4, kind: input, shape index: {}]   ;;  %s3675_s5 = inlined_call_operand.vmem [shape: bf16[512,256], index: 5, kind: input, shape index: {}]   ;;  %s3676_s6 = inlined_call_operand.vmem [shape: f32[1,256], index: 6, kind: input, shape index: {}]   ;;  %s3677_s7 = inlined_call_operand.vmem [shape: f32[16,256], index: 7, kind: output, shape index: {0}]   ;;  %s3678_s8 = inlined_call_operand.vmem [shape: f32[16,256], index: 8, kind: output, shape index: {1}]   ;;  %s3679_s9 = inlined_call_operand.vmem [shape: f32[16,256], index: 9, kind: output, shape index: {2}]  }
   0x1 LB: > { %s2237_s10 = sadd.s32 4294967295, %s2851_s30   ;;  %p2241_p0 = scmp.ge.s32.totalorder %s2851_s30, 1  ;;  %s2851_s30 = sphi %s2904_s30, %s20_s30  }
   0x2   : > { %p292_p1 = scmp.lt.s32.totalorder %s2851_s30, 3 }
   0x4   : > { %p293_p2 = pnand %p2241_p0, %p292_p1 }
   0x5   : > { %v2501_v0 = vld [vmem:[%s3671_s1 + $0x4] ss:$8 sps:$4 sm:$0xff] (!%p293_p2)   ;;  %v2503_v1 = vld [vmem:[%s3671_s1] ss:$8 sps:$4 sm:$0xff] (!%p293_p2)   ;;  %v2504_v2 = vld [vmem:[%s3671_s1 + $0x14] ss:$8 sps:$4 sm:$0xff] (!%p293_p2)  }
   0x6   : > { %296 = sbr.rel (%p293_p2) target bundleno = 871 (0x367), region = 48  ;;  %566 = vmatprep.subr.bf16.mxu0 (!%p293_p2), %v2501_v0  ;;  %v2506_v3 = vld [vmem:[%s3671_s1 + $0x10] ss:$8 sps:$4 sm:$0xff] (!%p293_p2)   ;;  %v2507_v4 = vld [vmem:[%s3671_s1 + $0x24] ss:$8 sps:$4 sm:$0xff] (!%p293_p2)   ;;  %p338_p3 = scmp.lt.s32.totalorder (!%p293_p2), %s2237_s10, 1 }
   0x7   : > { %567 = vmatpush1.bf16.msra.mxu0 (!%p293_p2), %v2503_v1  ;;  %v2509_v5 = vld [vmem:[%s3671_s1 + $0x20] ss:$8 sps:$4 sm:$0xff] (!%p293_p2)   ;;  %v2510_v6 = vld [vmem:[%s3671_s1 + $0x34] ss:$8 sps:$4 sm:$0xff] (!%p293_p2)   ;;  %v2512_v7 = vld [vmem:[%s3671_s1 + $0x30] ss:$8 sps:$4 sm:$0xff] (!%p293_p2)  }
   0x8   : > { %568 = vmatprep.subr.bf16.mxu0 (!%p293_p2), %v2504_v2  ;;  %v2513_v8 = vld [vmem:[%s3671_s1 + $0x44] ss:$8 sps:$4 sm:$0xff] (!%p293_p2)   ;;  %v2515_v9 = vld [vmem:[%s3671_s1 + $0x40] ss:$8 sps:$4 sm:$0xff] (!%p293_p2)   ;;  %v2516_v10 = vld [vmem:[%s3671_s1 + $0x54] ss:$8 sps:$4 sm:$0xff] (!%p293_p2)  }
   0x9   : > { %v2518_v11 = vld [vmem:[%s3671_s1 + $0x50] ss:$8 sps:$4 sm:$0xff] (!%p293_p2)   ;;  %v2519_v12 = vld [vmem:[%s3671_s1 + $0x64] ss:$8 sps:$4 sm:$0xff] (!%p293_p2)   ;;  %v2521_v16 = vld [vmem:[%s3671_s1 + $0x60] ss:$8 sps:$4 sm:$0xff] (!%p293_p2)  }
   0xa   : > { %v2549_v15 = vld [vmem:[%s3673_s3 + $0x4] ss:$16 sps:$4 sm:$0xff] (!%p293_p2)   ;;  %v2554_v18 = vld [vmem:[%s3673_s3] ss:$16 sps:$4 sm:$0xff] (!%p293_p2)   ;;  %v2553_v56 = vld [vmem:[%s3673_s3 + $0xc] ss:$16 sps:$4 sm:$0xff] (!%p293_p2)  }
   0xb   : > { %569 = vmatpush1.bf16.msra.mxu0 (!%p293_p2), %v2506_v3  ;;  %v2522_v17 = vld [vmem:[%s3671_s1 + $0x74] ss:$8 sps:$4 sm:$0xff] (!%p293_p2)   ;;  %1444 = vmatprep.subr.bf16.mxu1 (!%p293_p2), %v2549_v15  ;;  %v2524_v20 = vld [vmem:[%s3671_s1 + $0x70] ss:$8 sps:$4 sm:$0xff] (!%p293_p2)   ;;  %v2525_v21 = vld [vmem:[%s3671_s1 + $0x84] ss:$8 sps:$4 sm:$0xff] (!%p293_p2)  }
   0xc   : > { %570 = vmatprep.subr.bf16.mxu0 (!%p293_p2), %v2507_v4  ;;  %v2555_v19 = vld [vmem:[%s3673_s3 + $0x24] ss:$16 sps:$4 sm:$0xff] (!%p293_p2)   ;;  %1445 = vmatpush1.bf16.msra.mxu1 (!%p293_p2), %v2554_v18  ;;  %v2560_v22 = vld [vmem:[%s3673_s3 + $0x20] ss:$16 sps:$4 sm:$0xff] (!%p293_p2)   ;;  %v2551_v57 = vld [vmem:[%s3673_s3 + $0x8] ss:$16 sps:$4 sm:$0xff] (!%p293_p2)  }
   0xd   : > { %s3681_s10 = smov (!%p338_p3, %s2237_s10), 1  ;;  %1446 = vmatprep.subr.bf16.mxu1 %v2555_v19  ;;  %v2561_v23 = vld [vmem:[%s3673_s3 + $0x44] ss:$16 sps:$4 sm:$0xff]   ;;  %v2527_v24 = vld [vmem:[%s3671_s1 + $0x80] ss:$8 sps:$4 sm:$0xff]   ;;  %s2853_s16 = smov 64  }
   0xe   : > { %s2942_s12 = sshll.u32 %s3681_s10, 4  ;;  %v2566_v25 = vld [vmem:[%s3673_s3 + $0x40] ss:$16 sps:$4 sm:$0xff]   ;;  %v2567_v26 = vld [vmem:[%s3673_s3 + $0x64] ss:$16 sps:$4 sm:$0xff]  }
   0xf   : > { %571 = vmatpush1.bf16.msra.mxu0 %v2509_v5  ;;  %s2951_s17 = scalar_lea.vmem %s3670_s0, %s2942_s12  ;;  %v2528_v27 = vld [vmem:[%s3671_s1 + $0x94] ss:$8 sps:$4 sm:$0xff]   ;;  %v2530_v28 = vld [vmem:[%s3671_s1 + $0x90] ss:$8 sps:$4 sm:$0xff]   ;;  %v2531_v31 = vld [vmem:[%s3671_s1 + $0xa4] ss:$8 sps:$4 sm:$0xff]   ;;  %s352_s15 = scalar_lea.vmem %s3678_s8, %s2942_s12 }
  0x10   : > { %572 = vmatprep.subr.bf16.mxu0 %v2510_v6  ;;  %v359_v13 = vld [vmem:[%s2951_s17 + $0x8] sm:$0xff]  ;;  %1447 = vmatpush1.bf16.msra.mxu1 %v2560_v22  ;;  %v2572_v29 = vld [vmem:[%s3673_s3 + $0x60] ss:$16 sps:$4 sm:$0xff]   ;;  %v2573_v30 = vld [vmem:[%s3673_s3 + $0x84] ss:$16 sps:$4 sm:$0xff]   ;;  %s357_s21 = scalar_lea.vmem %s3679_s9, %s2942_s12  ;;  %s347_s26 = scalar_lea.vmem %s3677_s7, %s2942_s12 }
  0x11   : > { %v361_v14 = vpack.c.bf16 %v359_v13, %v359_v13  ;;  %1448 = vmatprep.subr.bf16.mxu1 %v2561_v23  ;;  %v2533_v32 = vld [vmem:[%s3671_s1 + $0xa0] ss:$8 sps:$4 sm:$0xff]   ;;  %v2579_v34 = vld [vmem:[%s3673_s3 + $0xa4] ss:$16 sps:$4 sm:$0xff]   ;;  %v2536_v36 = vld [vmem:[%s3671_s1 + $0xb0] ss:$8 sps:$4 sm:$0xff]  }
  0x12   : > { %v2578_v33 = vld [vmem:[%s3673_s3 + $0x80] ss:$16 sps:$4 sm:$0xff]   ;;  %v2534_v35 = vld [vmem:[%s3671_s1 + $0xb4] ss:$8 sps:$4 sm:$0xff]   ;;  %v2537_v39 = vld [vmem:[%s3671_s1 + $0xc4] ss:$8 sps:$4 sm:$0xff]  }
  0x13   : > { %573 = vmatpush1.bf16.msra.mxu0 %v2512_v7  ;;  %598 = vmatprep.mubr.bf16.mxu0 %v361_v14  ;;  %v2584_v37 = vld [vmem:[%s3673_s3 + $0xa0] ss:$16 sps:$4 sm:$0xff]   ;;  %v2585_v38 = vld [vmem:[%s3673_s3 + $0xc4] ss:$16 sps:$4 sm:$0xff]   ;;  %v2559_v61 = vld [vmem:[%s3673_s3 + $0x2c] ss:$16 sps:$4 sm:$0xff]  }
  0x14   : > { %574 = vmatprep.subr.bf16.mxu0 %v2513_v8  ;;  %1449 = vmatpush1.bf16.msra.mxu1 %v2566_v25  ;;  %v2539_v40 = vld [vmem:[%s3671_s1 + $0xc0] ss:$8 sps:$4 sm:$0xff]   ;;  %v2591_v42 = vld [vmem:[%s3673_s3 + $0xe4] ss:$16 sps:$4 sm:$0xff]   ;;  %v2542_v44 = vld [vmem:[%s3671_s1 + $0xd0] ss:$8 sps:$4 sm:$0xff]  }
  0x15   : > { %1450 = vmatprep.subr.bf16.mxu1 %v2567_v26  ;;  %v2590_v41 = vld [vmem:[%s3673_s3 + $0xc0] ss:$16 sps:$4 sm:$0xff]   ;;  %v2540_v43 = vld [vmem:[%s3671_s1 + $0xd4] ss:$8 sps:$4 sm:$0xff]   ;;  %v2543_v47 = vld [vmem:[%s3671_s1 + $0xe4] ss:$8 sps:$4 sm:$0xff]  }
  0x16   : > { %v2596_v45 = vld [vmem:[%s3673_s3 + $0xe0] ss:$16 sps:$4 sm:$0xff]   ;;  %v2597_v46 = vld [vmem:[%s3673_s3 + $0x104] ss:$16 sps:$4 sm:$0xff]   ;;  %v2557_v63 = vld [vmem:[%s3673_s3 + $0x28] ss:$16 sps:$4 sm:$0xff]  }
  0x17   : > { %575 = vmatpush1.bf16.msra.mxu0 %v2515_v9  ;;  %v2545_v48 = vld [vmem:[%s3671_s1 + $0xe0] ss:$8 sps:$4 sm:$0xff]   ;;  %v2603_v50 = vld [vmem:[%s3673_s3 + $0x124] ss:$16 sps:$4 sm:$0xff]   ;;  %v2548_v52 = vld [vmem:[%s3671_s1 + $0xf0] ss:$8 sps:$4 sm:$0xff]  }
  0x18   : > { %576 = vmatprep.subr.bf16.mxu0 %v2516_v10  ;;  %1451 = vmatpush1.bf16.msra.mxu1 %v2572_v29  ;;  %v2602_v49 = vld [vmem:[%s3673_s3 + $0x100] ss:$16 sps:$4 sm:$0xff]   ;;  %v2546_v51 = vld [vmem:[%s3671_s1 + $0xf4] ss:$8 sps:$4 sm:$0xff]   ;;  %v2563_v3 = vld [vmem:[%s3673_s3 + $0x48] ss:$16 sps:$4 sm:$0xff]  }
  0x19   : > { %1452 = vmatprep.subr.bf16.mxu1 %v2573_v30  ;;  %v358_v53 = vld [vmem:[%s2951_s17] sm:$0xff]  ;;  %v2565_v1 = vld [vmem:[%s3673_s3 + $0x4c] ss:$16 sps:$4 sm:$0xff]   ;;  %v2569_v7 = vld [vmem:[%s3673_s3 + $0x68] ss:$16 sps:$4 sm:$0xff]  }
  0x1a   : > { %v2608_v54 = vld [vmem:[%s3673_s3 + $0x120] ss:$16 sps:$4 sm:$0xff]   ;;  %v2609_v55 = vld [vmem:[%s3673_s3 + $0x144] ss:$16 sps:$4 sm:$0xff]   ;;  %v360_v60 = vpack.c.bf16 %v358_v53, %v358_v53  ;;  %v2571_v5 = vld [vmem:[%s3673_s3 + $0x6c] ss:$16 sps:$4 sm:$0xff]  }
  0x1b   : > { %577 = vmatpush1.bf16.msra.mxu0 %v2518_v11  ;;  %v2614_v58 = vld [vmem:[%s3673_s3 + $0x140] ss:$16 sps:$4 sm:$0xff]   ;;  %v2615_v59 = vld [vmem:[%s3673_s3 + $0x164] ss:$16 sps:$4 sm:$0xff]   ;;  %v2577_v9 = vld [vmem:[%s3673_s3 + $0x8c] ss:$16 sps:$4 sm:$0xff]  }
  0x1c   : > { %578 = vmatprep.subr.bf16.mxu0 %v2519_v12  ;;  %1453 = vmatpush1.bf16.msra.mxu1 %v2578_v33  ;;  %v2620_v62 = vld [vmem:[%s3673_s3 + $0x160] ss:$16 sps:$4 sm:$0xff]   ;;  %v2621_v0 = vld [vmem:[%s3673_s3 + $0x184] ss:$16 sps:$4 sm:$0xff]   ;;  %v2575_v10 = vld [vmem:[%s3673_s3 + $0x88] ss:$16 sps:$4 sm:$0xff]  }
  0x1d   : > { %1454 = vmatprep.subr.bf16.mxu1 %v2579_v34  ;;  %v2626_v2 = vld [vmem:[%s3673_s3 + $0x180] ss:$16 sps:$4 sm:$0xff]   ;;  %v2627_v4 = vld [vmem:[%s3673_s3 + $0x1a4] ss:$16 sps:$4 sm:$0xff]   ;;  %v2583_v11 = vld [vmem:[%s3673_s3 + $0xac] ss:$16 sps:$4 sm:$0xff]  }
  0x1e   : > { %v2632_v6 = vld [vmem:[%s3673_s3 + $0x1a0] ss:$16 sps:$4 sm:$0xff]   ;;  %v2633_v8 = vld [vmem:[%s3673_s3 + $0x1c4] ss:$16 sps:$4 sm:$0xff]   ;;  %v2581_v12 = vld [vmem:[%s3673_s3 + $0xa8] ss:$16 sps:$4 sm:$0xff]  }
  0x1f   : > { %579 = vmatpush1.bf16.msra.mxu0 %v2521_v16  ;;  %v2589_v13 = vld [vmem:[%s3673_s3 + $0xcc] ss:$16 sps:$4 sm:$0xff]   ;;  %v2587_v14 = vld [vmem:[%s3673_s3 + $0xc8] ss:$16 sps:$4 sm:$0xff]  }
  0x20   : > { %580 = vmatprep.subr.bf16.mxu0 %v2522_v17  ;;  %1455 = vmatpush1.bf16.msra.mxu1 %v2584_v37  ;;  %v2595_v15 = vld [vmem:[%s3673_s3 + $0xec] ss:$16 sps:$4 sm:$0xff]   ;;  %v2593_v16 = vld [vmem:[%s3673_s3 + $0xe8] ss:$16 sps:$4 sm:$0xff]  }
  0x21   : > { %1456 = vmatprep.subr.bf16.mxu1 %v2585_v38  ;;  %v2601_v17 = vld [vmem:[%s3673_s3 + $0x10c] ss:$16 sps:$4 sm:$0xff]   ;;  %v2599_v18 = vld [vmem:[%s3673_s3 + $0x108] ss:$16 sps:$4 sm:$0xff]   ;;  %v396_v38 = vlaneseq }
  0x22   : > { %v2607_v19 = vld [vmem:[%s3673_s3 + $0x12c] ss:$16 sps:$4 sm:$0xff]   ;;  %v2611_v22 = vld [vmem:[%s3673_s3 + $0x148] ss:$16 sps:$4 sm:$0xff]  }
  0x23   : > { %581 = vmatpush1.bf16.msra.mxu0 %v2524_v20  ;;  %v2605_v20 = vld [vmem:[%s3673_s3 + $0x128] ss:$16 sps:$4 sm:$0xff]   ;;  %v2619_v23 = vld [vmem:[%s3673_s3 + $0x16c] ss:$16 sps:$4 sm:$0xff]  }
  0x24   : > { %582 = vmatprep.subr.bf16.mxu0 %v2525_v21  ;;  %1457 = vmatpush1.bf16.msra.mxu1 %v2590_v41  ;;  %v2613_v21 = vld [vmem:[%s3673_s3 + $0x14c] ss:$16 sps:$4 sm:$0xff]   ;;  %v2623_v26 = vld [vmem:[%s3673_s3 + $0x188] ss:$16 sps:$4 sm:$0xff]   ;;  %v394_v41 = vld [vmem:[%s3672_s2] sm:$0x3] }
  0x25   : > { %1458 = vmatprep.subr.bf16.mxu1 %v2591_v42  ;;  %v2625_v25 = vld [vmem:[%s3673_s3 + $0x18c] ss:$16 sps:$4 sm:$0xff]   ;;  %v2635_v30 = vld [vmem:[%s3673_s3 + $0x1c8] ss:$16 sps:$4 sm:$0xff]  }
  0x26   : > { %v2637_v29 = vld [vmem:[%s3673_s3 + $0x1cc] ss:$16 sps:$4 sm:$0xff]   ;;  %v2641_v34 = vld [vmem:[%s3673_s3 + $0x1e8] ss:$16 sps:$4 sm:$0xff]  }
  0x27   : > { %583 = vmatpush1.bf16.msra.mxu0 %v2527_v24  ;;  %v2617_v24 = vld [vmem:[%s3673_s3 + $0x168] ss:$16 sps:$4 sm:$0xff]   ;;  %v2643_v33 = vld [vmem:[%s3673_s3 + $0x1ec] ss:$16 sps:$4 sm:$0xff]  }
  0x28   : > { %584 = vmatprep.subr.bf16.mxu0 %v2528_v27  ;;  %1459 = vmatpush1.bf16.msra.mxu1 %v2596_v45  ;;  %v2631_v27 = vld [vmem:[%s3673_s3 + $0x1ac] ss:$16 sps:$4 sm:$0xff]  }
  0x29   : > { %1460 = vmatprep.subr.bf16.mxu1 %v2597_v46  ;;  %v2650_v37 = vld [vmem:[%s3673_s3 + $0x20c] ss:$16 sps:$4 sm:$0xff]  }
  0x2b   : > { %585 = vmatpush1.bf16.msra.mxu0 %v2530_v28  ;;  %v2629_v28 = vld [vmem:[%s3673_s3 + $0x1a8] ss:$16 sps:$4 sm:$0xff]  }
  0x2c   : > { %586 = vmatprep.subr.bf16.mxu0 %v2531_v31  ;;  %1461 = vmatpush1.bf16.msra.mxu1 %v2602_v49  ;;  %v2638_v31 = vld [vmem:[%s3673_s3 + $0x1c0] ss:$16 sps:$4 sm:$0xff]  }
  0x2d   : > { %1462 = vmatprep.subr.bf16.mxu1 %v2603_v50 }
  0x2f   : > { %587 = vmatpush1.bf16.msra.mxu0 %v2533_v32  ;;  %v2639_v32 = vld [vmem:[%s3673_s3 + $0x1e4] ss:$16 sps:$4 sm:$0xff]  }
  0x30   : > { %588 = vmatprep.subr.bf16.mxu0 %v2534_v35  ;;  %1463 = vmatpush1.bf16.msra.mxu1 %v2608_v54  ;;  %v2644_v35 = vld [vmem:[%s3673_s3 + $0x1e0] ss:$16 sps:$4 sm:$0xff]   ;;  %v2648_v54 = vld [vmem:[%s3673_s3 + $0x208] ss:$16 sps:$4 sm:$0xff]  }
  0x31   : > { %1464 = vmatprep.subr.bf16.mxu1 %v2609_v55  ;;  %v2653_v55 = vld [vmem:[%s3673_s3 + $0x224] ss:$16 sps:$4 sm:$0xff]  }
  0x33   : > { %589 = vmatpush1.bf16.msra.mxu0 %v2536_v36  ;;  %v2647_v36 = vld [vmem:[%s3673_s3 + $0x204] ss:$16 sps:$4 sm:$0xff]  }
  0x34   : > { %590 = vmatprep.subr.bf16.mxu0 %v2537_v39  ;;  %1465 = vmatpush1.bf16.msra.mxu1 %v2614_v58  ;;  %v3217_v39 = vshrl.u32 %v396_v38, 7  ;;  %v2654_v58 = vld [vmem:[%s3673_s3 + $0x228] ss:$16 sps:$4 sm:$0xff]  }
  0x35   : > { %1466 = vmatprep.subr.bf16.mxu1 %v2615_v59  ;;  %v2659_v59 = vld [vmem:[%s3673_s3 + $0x244] ss:$16 sps:$4 sm:$0xff]  }
  0x36   : > { %v3226_v42 = vsub.s32 1, %v3217_v39 }
  0x37   : > { %591 = vmatpush1.bf16.msra.mxu0 %v2539_v40  ;;  %v3220_v40 = vsub.s32 0, %v3217_v39 }
  0x38   : > { %592 = vmatprep.subr.bf16.mxu0 %v2540_v43  ;;  %1467 = vmatpush1.bf16.msra.mxu1 %v2620_v62  ;;  %v2660_v62 = vld [vmem:[%s3673_s3 + $0x248] ss:$16 sps:$4 sm:$0xff]  }
  0x39   : > { %1468 = vmatprep.subr.bf16.mxu1 %v2621_v0  ;;  %v399_v43 = vrot.slane %v394_v41, %v3220_v40  ;;  %v2668_v0 = vld [vmem:[%s3673_s3 + $0x26c] ss:$16 sps:$4 sm:$0xff]  }
  0x3b   : > { %593 = vmatpush1.bf16.msra.mxu0 %v2542_v44  ;;  %v403_v44 = vrot.slane %v394_v41, %v3226_v42  ;;  %v2720_v41 = vld [vmem:[%s3673_s3 + $0x388] ss:$16 sps:$4 sm:$0xff]  }
  0x3c   : > { %594 = vmatprep.subr.bf16.mxu0 %v2543_v47  ;;  %1469 = vmatpush1.bf16.msra.mxu1 %v2626_v2  ;;  %v2666_v2 = vld [vmem:[%s3673_s3 + $0x268] ss:$16 sps:$4 sm:$0xff]  }
  0x3d   : > { %1470 = vmatprep.subr.bf16.mxu1 %v2627_v4  ;;  %v2674_v4 = vld [vmem:[%s3673_s3 + $0x28c] ss:$16 sps:$4 sm:$0xff]  }
  0x3f   : > { %595 = vmatpush1.bf16.msra.mxu0 %v2545_v48 }
  0x40   : > { %596 = vmatprep.subr.bf16.mxu0 %v2546_v51  ;;  %1471 = vmatpush1.bf16.msra.mxu1 %v2632_v6  ;;  %v2672_v6 = vld [vmem:[%s3673_s3 + $0x288] ss:$16 sps:$4 sm:$0xff]  }
  0x41   : > { %1472 = vmatprep.subr.bf16.mxu1 %v2633_v8  ;;  %v2680_v8 = vld [vmem:[%s3673_s3 + $0x2ac] ss:$16 sps:$4 sm:$0xff]  }
  0x43   : > { %597 = vmatpush1.bf16.msra.mxu0 %v2548_v52  ;;  %v2645_v52 = vld [vmem:[%s3673_s3 + $0x200] ss:$16 sps:$4 sm:$0xff]  }
  0x44   : > { %1526 = vmatprep.subr.bf16.mxu0 %v2553_v56  ;;  %1473 = vmatpush1.bf16.msra.mxu1 %v2638_v31  ;;  %v2656_v56 = vld [vmem:[%s3673_s3 + $0x22c] ss:$16 sps:$4 sm:$0xff]   ;;  %v2713_v31 = vld [vmem:[%s3673_s3 + $0x364] ss:$16 sps:$4 sm:$0xff]  }
  0x45   : > { %1474 = vmatprep.subr.bf16.mxu1 %v2639_v32  ;;  %v2716_v32 = vld [vmem:[%s3673_s3 + $0x36c] ss:$16 sps:$4 sm:$0xff]  }
  0x46   : > { %599 = vmatmul.mubr.bf16.vlgmr.msra.gmra.mrb[0].mxu0 %v360_v60  ;;  %v2662_v60 = vld [vmem:[%s3673_s3 + $0x24c] ss:$16 sps:$4 sm:$0xff]  }
  0x47   : > { %1527 = vmatpush1.bf16.msra.mxu0 %v2551_v57  ;;  %v2651_v57 = vld [vmem:[%s3673_s3 + $0x220] ss:$16 sps:$4 sm:$0xff]  }
  0x48   : > { %1528 = vmatprep.subr.bf16.mxu0 %v2559_v61  ;;  %1475 = vmatpush1.bf16.msra.mxu1 %v2644_v35  ;;  %v2657_v61 = vld [vmem:[%s3673_s3 + $0x240] ss:$16 sps:$4 sm:$0xff]   ;;  %v2719_v35 = vld [vmem:[%s3673_s3 + $0x384] ss:$16 sps:$4 sm:$0xff]  }
  0x49   : > { %1485 = vmatprep.subr.bf16.mxu1 %v2647_v36  ;;  %v2722_v36 = vld [vmem:[%s3673_s3 + $0x38c] ss:$16 sps:$4 sm:$0xff]  }
  0x4b   : > { %1529 = vmatpush1.bf16.msra.mxu0 %v2557_v63  ;;  %v2665_v63 = vld [vmem:[%s3673_s3 + $0x264] ss:$16 sps:$4 sm:$0xff]  }
  0x4c   : > { %1530 = vmatprep.subr.bf16.mxu0 %v2565_v1  ;;  %v2663_v1 = vld [vmem:[%s3673_s3 + $0x260] ss:$16 sps:$4 sm:$0xff]  }
  0x4f   : > { %1531 = vmatpush1.bf16.msra.mxu0 %v2563_v3  ;;  %v2671_v3 = vld [vmem:[%s3673_s3 + $0x284] ss:$16 sps:$4 sm:$0xff]  }
  0x50   : > { %1532 = vmatprep.subr.bf16.mxu0 %v2571_v5  ;;  %v2669_v5 = vld [vmem:[%s3673_s3 + $0x280] ss:$16 sps:$4 sm:$0xff]  }
  0x53   : > { %1533 = vmatpush1.bf16.msra.mxu0 %v2569_v7  ;;  %v2677_v7 = vld [vmem:[%s3673_s3 + $0x2a4] ss:$16 sps:$4 sm:$0xff]  }
  0x54   : > { %1534 = vmatprep.subr.bf16.mxu0 %v2577_v9  ;;  %v2675_v9 = vld [vmem:[%s3673_s3 + $0x2a0] ss:$16 sps:$4 sm:$0xff]  }
  0x57   : > { %1535 = vmatpush1.bf16.msra.mxu0 %v2575_v10  ;;  %v2678_v10 = vld [vmem:[%s3673_s3 + $0x2a8] ss:$16 sps:$4 sm:$0xff]  }
  0x58   : > { %1536 = vmatprep.subr.bf16.mxu0 %v2583_v11  ;;  %v2683_v11 = vld [vmem:[%s3673_s3 + $0x2c4] ss:$16 sps:$4 sm:$0xff]  }
  0x5b   : > { %1537 = vmatpush1.bf16.msra.mxu0 %v2581_v12  ;;  %v2686_v12 = vld [vmem:[%s3673_s3 + $0x2cc] ss:$16 sps:$4 sm:$0xff]  }
  0x5c   : > { %1538 = vmatprep.subr.bf16.mxu0 %v2589_v13  ;;  %v2681_v13 = vld [vmem:[%s3673_s3 + $0x2c0] ss:$16 sps:$4 sm:$0xff]  }
  0x5f   : > { %1539 = vmatpush1.bf16.msra.mxu0 %v2587_v14  ;;  %v2684_v14 = vld [vmem:[%s3673_s3 + $0x2c8] ss:$16 sps:$4 sm:$0xff]  }
  0x60   : > { %1540 = vmatprep.subr.bf16.mxu0 %v2595_v15  ;;  %v2689_v15 = vld [vmem:[%s3673_s3 + $0x2e4] ss:$16 sps:$4 sm:$0xff]  }
  0x63   : > { %1541 = vmatpush1.bf16.msra.mxu0 %v2593_v16  ;;  %v2692_v16 = vld [vmem:[%s3673_s3 + $0x2ec] ss:$16 sps:$4 sm:$0xff]  }
  0x64   : > { %1542 = vmatprep.subr.bf16.mxu0 %v2601_v17  ;;  %v2687_v17 = vld [vmem:[%s3673_s3 + $0x2e0] ss:$16 sps:$4 sm:$0xff]  }
  0x67   : > { %1543 = vmatpush1.bf16.msra.mxu0 %v2599_v18  ;;  %v2690_v18 = vld [vmem:[%s3673_s3 + $0x2e8] ss:$16 sps:$4 sm:$0xff]  }
  0x68   : > { %1544 = vmatprep.subr.bf16.mxu0 %v2607_v19  ;;  %v2695_v19 = vld [vmem:[%s3673_s3 + $0x304] ss:$16 sps:$4 sm:$0xff]  }
  0x6b   : > { %1545 = vmatpush1.bf16.msra.mxu0 %v2605_v20  ;;  %v2698_v20 = vld [vmem:[%s3673_s3 + $0x30c] ss:$16 sps:$4 sm:$0xff]  }
  0x6c   : > { %1546 = vmatprep.subr.bf16.mxu0 %v2613_v21  ;;  %v2693_v21 = vld [vmem:[%s3673_s3 + $0x300] ss:$16 sps:$4 sm:$0xff]  }
  0x6f   : > { %1547 = vmatpush1.bf16.msra.mxu0 %v2611_v22  ;;  %v2696_v22 = vld [vmem:[%s3673_s3 + $0x308] ss:$16 sps:$4 sm:$0xff]  }
  0x70   : > { %1548 = vmatprep.subr.bf16.mxu0 %v2619_v23  ;;  %v2701_v23 = vld [vmem:[%s3673_s3 + $0x324] ss:$16 sps:$4 sm:$0xff]  }
  0x73   : > { %1549 = vmatpush1.bf16.msra.mxu0 %v2617_v24  ;;  %v2704_v24 = vld [vmem:[%s3673_s3 + $0x32c] ss:$16 sps:$4 sm:$0xff]  }
  0x74   : > { %1550 = vmatprep.subr.bf16.mxu0 %v2625_v25  ;;  %v2699_v25 = vld [vmem:[%s3673_s3 + $0x320] ss:$16 sps:$4 sm:$0xff]  }
  0x77   : > { %1551 = vmatpush1.bf16.msra.mxu0 %v2623_v26  ;;  %v2702_v26 = vld [vmem:[%s3673_s3 + $0x328] ss:$16 sps:$4 sm:$0xff]  }
  0x78   : > { %1552 = vmatprep.subr.bf16.mxu0 %v2631_v27  ;;  %v2707_v27 = vld [vmem:[%s3673_s3 + $0x344] ss:$16 sps:$4 sm:$0xff]  }
  0x7b   : > { %1553 = vmatpush1.bf16.msra.mxu0 %v2629_v28  ;;  %v2710_v28 = vld [vmem:[%s3673_s3 + $0x34c] ss:$16 sps:$4 sm:$0xff]  }
  0x7c   : > { %1554 = vmatprep.subr.bf16.mxu0 %v2637_v29  ;;  %v2705_v29 = vld [vmem:[%s3673_s3 + $0x340] ss:$16 sps:$4 sm:$0xff]  }
  0x7f   : > { %1555 = vmatpush1.bf16.msra.mxu0 %v2635_v30  ;;  %v2708_v30 = vld [vmem:[%s3673_s3 + $0x348] ss:$16 sps:$4 sm:$0xff]  }
  0x80   : > { %1556 = vmatprep.subr.bf16.mxu0 %v2643_v33  ;;  %v2711_v33 = vld [vmem:[%s3673_s3 + $0x360] ss:$16 sps:$4 sm:$0xff]  }
  0x83   : > { %1557 = vmatpush1.bf16.msra.mxu0 %v2641_v34  ;;  %v2714_v34 = vld [vmem:[%s3673_s3 + $0x368] ss:$16 sps:$4 sm:$0xff]  }
  0x84   : > { %1567 = vmatprep.subr.bf16.mxu0 %v2650_v37  ;;  %v2717_v37 = vld [vmem:[%s3673_s3 + $0x380] ss:$16 sps:$4 sm:$0xff]  }
 0x119   : > { %v600_v45 = vpop.f32.mrb[0].mxu0 }
 0x11a   : > { %v3234_v46 = vadd.f32 %v600_v45, %v399_v43  ;;  %v602_v47 = vpop.f32.mrb[1].mxu0  ;;  %v2725_v43 = vld [vmem:[%s3673_s3 + $0x3a4] ss:$16 sps:$4 sm:$0xff]   ;;  %v2723_v45 = vld [vmem:[%s3673_s3 + $0x3a0] ss:$16 sps:$4 sm:$0xff]  }
 0x11b   : > { %v3236_v48 = vadd.f32 %v602_v47, %v403_v44  ;;  %v604_v49 = vpop.f32.mrb[2].mxu0  ;;  %v2728_v44 = vld [vmem:[%s3673_s3 + $0x3ac] ss:$16 sps:$4 sm:$0xff]   ;;  %v2726_v47 = vld [vmem:[%s3673_s3 + $0x3a8] ss:$16 sps:$4 sm:$0xff]  }
 0x11c   : > { %646 = vst [vmem:[%s352_s15] sm:$0xff] %v3234_v46  ;;  %v605_v50 = vpop.f32.mrb[3].mxu0  ;;  %625 = vrot.lane.b32.xlu0 %v3234_v46, %s2853_s16  ;;  %v650_v53 = vpack.c.bf16 %v3234_v46, %v3234_v46  ;;  %v2731_v49 = vld [vmem:[%s3673_s3 + $0x3c4] ss:$16 sps:$4 sm:$0xff]  }
 0x11d   : > { %647 = vst [vmem:[%s352_s15 + $0x8] sm:$0xff] %v3236_v48  ;;  %v651_v51 = vpack.c.bf16 %v3236_v48, %v3236_v48  ;;  %v2734_v50 = vld [vmem:[%s3673_s3 + $0x3cc] ss:$16 sps:$4 sm:$0xff]  }
 0x11f   : > { %1476 = vmatprep.mubr.bf16.mxu1 %v651_v51  ;;  %1558 = vmatprep.mubr.bf16.mxu0 %v651_v51  ;;  %v2729_v51 = vld [vmem:[%s3673_s3 + $0x3c0] ss:$16 sps:$4 sm:$0xff]  }
 0x120   : > { %627 = vrot.lane.b32.xlu0 %v3236_v48, %s2853_s16  ;;  %1477 = vmatmul.mubr.bf16.vlgmr.msra.gmra.mrb[0].mxu1 %v650_v53 }
 0x121   : > { %1559 = vmatmul.mubr.bf16.vlgmr.msra.gmra.mrb[4].mxu0 %v650_v53  ;;  %1486 = vmatpush1.bf16.msra.mxu1 %v2645_v52  ;;  %v2732_v52 = vld [vmem:[%s3673_s3 + $0x3c8] ss:$16 sps:$4 sm:$0xff]   ;;  %v2737_v53 = vld [vmem:[%s3673_s3 + $0x3e4] ss:$16 sps:$4 sm:$0xff]  }
 0x122   : > { %1568 = vmatpush1.bf16.msra.mxu0 %v2648_v54  ;;  %1487 = vmatprep.subr.bf16.mxu1 %v2653_v55  ;;  %v2740_v54 = vld [vmem:[%s3673_s3 + $0x3ec] ss:$16 sps:$4 sm:$0xff]   ;;  %v2735_v55 = vld [vmem:[%s3673_s3 + $0x3e0] ss:$16 sps:$4 sm:$0xff]  }
 0x123   : > { %1569 = vmatprep.subr.bf16.mxu0 %v2656_v56  ;;  %v2738_v56 = vld [vmem:[%s3673_s3 + $0x3e8] ss:$16 sps:$4 sm:$0xff]  }
 0x125   : > { %1488 = vmatpush1.bf16.msra.mxu1 %v2651_v57  ;;  %v2743_v57 = vld [vmem:[%s3675_s5 + $0x4] ss:$8 sps:$4 sm:$0xff]  }
 0x126   : > { %1570 = vmatpush1.bf16.msra.mxu0 %v2654_v58  ;;  %1489 = vmatprep.subr.bf16.mxu1 %v2659_v59  ;;  %v2746_v58 = vld [vmem:[%s3675_s5 + $0x104] ss:$8 sps:$4 sm:$0xff]   ;;  %v608_v59 = vrot.slane %v3236_v48, 6 }
 0x127   : > { %1571 = vmatprep.subr.bf16.mxu0 %v2662_v60  ;;  %v607_v60 = vrot.slane %v3234_v46, 6 }
 0x129   : > { %1490 = vmatpush1.bf16.msra.mxu1 %v2657_v61  ;;  %v610_v61 = vsub.f32 %v3236_v48, %v608_v59  ;;  %v2777_v59 = vld [vmem:[%s3675_s5 + $0x60] ss:$8 sps:$4 sm:$0xff]  }
 0x12a   : > { %1572 = vmatpush1.bf16.msra.mxu0 %v2660_v62  ;;  %1491 = vmatprep.subr.bf16.mxu1 %v2665_v63  ;;  %v609_v62 = vsub.f32 %v3234_v46, %v607_v60  ;;  %v614_v63 = vrot.slane %v3236_v48, 4  ;;  %v2780_v60 = vld [vmem:[%s3675_s5 + $0x160] ss:$8 sps:$4 sm:$0xff]  }
 0x12b   : > { %1573 = vmatprep.subr.bf16.mxu0 %v2668_v0  ;;  %v613_v0 = vrot.slane %v3234_v46, 4 }
 0x12d   : > { %1492 = vmatpush1.bf16.msra.mxu1 %v2663_v1  ;;  %v612_v1 = vmax.f32 %v610_v61, 0.0  ;;  %v2785_v61 = vld [vmem:[%s3675_s5 + $0x74] ss:$8 sps:$4 sm:$0xff]  }
 0x12e   : > { %1574 = vmatpush1.bf16.msra.mxu0 %v2666_v2  ;;  %1493 = vmatprep.subr.bf16.mxu1 %v2671_v3  ;;  %v630_v2 = vand.u32 127, %v396_v38  ;;  %v611_v3 = vmax.f32 %v609_v62, 0.0  ;;  %v2788_v62 = vld [vmem:[%s3675_s5 + $0x174] ss:$8 sps:$4 sm:$0xff]  }
 0x12f   : > { %1575 = vmatprep.subr.bf16.mxu0 %v2674_v4 }
 0x130   : > { %vm631_vm0 = vcmp.lt.s32.totalorder %v630_v2, 64  ;;  %v2794_v2 = vld [vmem:[%s3675_s5 + $0x184] ss:$8 sps:$4 sm:$0xff]  }
 0x131   : > { %1494 = vmatpush1.bf16.msra.mxu1 %v2669_v5  ;;  %v616_v5 = vsub.f32 %v3236_v48, %v614_v63  ;;  %v2783_v63 = vld [vmem:[%s3675_s5 + $0x70] ss:$8 sps:$4 sm:$0xff]  }
 0x132   : > { %1576 = vmatpush1.bf16.msra.mxu0 %v2672_v6  ;;  %1495 = vmatprep.subr.bf16.mxu1 %v2677_v7  ;;  %v620_v6 = vrot.slane %v3236_v48, 2  ;;  %v615_v7 = vsub.f32 %v3234_v46, %v613_v0  ;;  %v2786_v0 = vld [vmem:[%s3675_s5 + $0x170] ss:$8 sps:$4 sm:$0xff]  }
 0x133   : > { %1577 = vmatprep.subr.bf16.mxu0 %v2680_v8  ;;  %v619_v8 = vrot.slane %v3234_v46, 2 }
 0x135   : > { %1496 = vmatpush1.bf16.msra.mxu1 %v2675_v9  ;;  %v618_v9 = vmax.f32 %v612_v1, %v616_v5  ;;  %v2791_v1 = vld [vmem:[%s3675_s5 + $0x84] ss:$8 sps:$4 sm:$0xff]   ;;  %v2797_v5 = vld [vmem:[%s3675_s5 + $0x94] ss:$8 sps:$4 sm:$0xff]  }
 0x136   : > { %1578 = vmatpush1.bf16.msra.mxu0 %v2678_v10  ;;  %1497 = vmatprep.subr.bf16.mxu1 %v2683_v11  ;;  %v617_v10 = vmax.f32 %v611_v3, %v615_v7  ;;  %v622_v11 = vsub.f32 %v3236_v48, %v620_v6  ;;  %v2789_v3 = vld [vmem:[%s3675_s5 + $0x80] ss:$8 sps:$4 sm:$0xff]   ;;  %v2800_v6 = vld [vmem:[%s3675_s5 + $0x194] ss:$8 sps:$4 sm:$0xff]   ;;  %v2795_v7 = vld [vmem:[%s3675_s5 + $0x90] ss:$8 sps:$4 sm:$0xff]  }
 0x137   : > { %1579 = vmatprep.subr.bf16.mxu0 %v2686_v12 }
 0x139   : > { %1498 = vmatpush1.bf16.msra.mxu1 %v2681_v13  ;;  %v621_v13 = vsub.f32 %v3234_v46, %v619_v8  ;;  %v2798_v8 = vld [vmem:[%s3675_s5 + $0x190] ss:$8 sps:$4 sm:$0xff]  }
 0x13a   : > { %1580 = vmatpush1.bf16.msra.mxu0 %v2684_v14  ;;  %1499 = vmatprep.subr.bf16.mxu1 %v2689_v15  ;;  %v624_v15 = vmax.f32 %v618_v9, %v622_v11  ;;  %v2803_v9 = vld [vmem:[%s3675_s5 + $0xa4] ss:$8 sps:$4 sm:$0xff]   ;;  %v2801_v11 = vld [vmem:[%s3675_s5 + $0xa0] ss:$8 sps:$4 sm:$0xff]  }
 0x13b   : > { %1581 = vmatprep.subr.bf16.mxu0 %v2692_v16  ;;  %v623_v16 = vmax.f32 %v617_v10, %v621_v13  ;;  %v2806_v10 = vld [vmem:[%s3675_s5 + $0x1a4] ss:$8 sps:$4 sm:$0xff]   ;;  %v2809_v13 = vld [vmem:[%s3675_s5 + $0xb4] ss:$8 sps:$4 sm:$0xff]  }
 0x13d   : > { %1500 = vmatpush1.bf16.msra.mxu1 %v2687_v17 }
 0x13e   : > { %1582 = vmatpush1.bf16.msra.mxu0 %v2690_v18  ;;  %1501 = vmatprep.subr.bf16.mxu1 %v2695_v19 }
 0x13f   : > { %1583 = vmatprep.subr.bf16.mxu0 %v2698_v20 }
 0x141   : > { %1502 = vmatpush1.bf16.msra.mxu1 %v2693_v21  ;;  %v638_v21 = vsub.f32 %v3234_v46, %v3236_v48 }
 0x142   : > { %1584 = vmatpush1.bf16.msra.mxu0 %v2696_v22  ;;  %1503 = vmatprep.subr.bf16.mxu1 %v2701_v23  ;;  %v639_v22 = vsub.f32 %v3236_v48, %v3234_v46 }
 0x143   : > { %1585 = vmatprep.subr.bf16.mxu0 %v2704_v24 }
 0x145   : > { %1504 = vmatpush1.bf16.msra.mxu1 %v2699_v25 }
 0x146   : > { %1586 = vmatpush1.bf16.msra.mxu0 %v2702_v26  ;;  %1505 = vmatprep.subr.bf16.mxu1 %v2707_v27 }
 0x147   : > { %1587 = vmatprep.subr.bf16.mxu0 %v2710_v28 }
 0x149   : > { %1506 = vmatpush1.bf16.msra.mxu1 %v2705_v29 }
 0x14a   : > { %1588 = vmatpush1.bf16.msra.mxu0 %v2708_v30  ;;  %1507 = vmatprep.subr.bf16.mxu1 %v2713_v31  ;;  %v2741_v31 = vld [vmem:[%s3675_s5] ss:$8 sps:$4 sm:$0xff]  }
 0x14b   : > { %1589 = vmatprep.subr.bf16.mxu0 %v2716_v32  ;;  %v2752_v32 = vld [vmem:[%s3675_s5 + $0x114] ss:$8 sps:$4 sm:$0xff]  }
 0x14d   : > { %1508 = vmatpush1.bf16.msra.mxu1 %v2711_v33  ;;  %v2747_v33 = vld [vmem:[%s3675_s5 + $0x10] ss:$8 sps:$4 sm:$0xff]  }
 0x14e   : > { %1590 = vmatpush1.bf16.msra.mxu0 %v2714_v34  ;;  %1509 = vmatprep.subr.bf16.mxu1 %v2719_v35  ;;  %v2750_v34 = vld [vmem:[%s3675_s5 + $0x110] ss:$8 sps:$4 sm:$0xff]   ;;  %v2755_v35 = vld [vmem:[%s3675_s5 + $0x24] ss:$8 sps:$4 sm:$0xff]  }
 0x14f   : > { %1591 = vmatprep.subr.bf16.mxu0 %v2722_v36  ;;  %v2758_v36 = vld [vmem:[%s3675_s5 + $0x124] ss:$8 sps:$4 sm:$0xff]  }
 0x151   : > { %1510 = vmatpush1.bf16.msra.mxu1 %v2717_v37  ;;  %v2753_v37 = vld [vmem:[%s3675_s5 + $0x20] ss:$8 sps:$4 sm:$0xff]  }
 0x152   : > { %1592 = vmatpush1.bf16.msra.mxu0 %v2720_v41  ;;  %1511 = vmatprep.subr.bf16.mxu1 %v2725_v43  ;;  %v2756_v41 = vld [vmem:[%s3675_s5 + $0x120] ss:$8 sps:$4 sm:$0xff]   ;;  %v2761_v43 = vld [vmem:[%s3675_s5 + $0x34] ss:$8 sps:$4 sm:$0xff]  }
 0x153   : > { %1593 = vmatprep.subr.bf16.mxu0 %v2728_v44  ;;  %v2764_v44 = vld [vmem:[%s3675_s5 + $0x134] ss:$8 sps:$4 sm:$0xff]  }
 0x155   : > { %1512 = vmatpush1.bf16.msra.mxu1 %v2723_v45  ;;  %v2759_v45 = vld [vmem:[%s3675_s5 + $0x30] ss:$8 sps:$4 sm:$0xff]  }
 0x156   : > { %1594 = vmatpush1.bf16.msra.mxu0 %v2726_v47  ;;  %1513 = vmatprep.subr.bf16.mxu1 %v2731_v49  ;;  %v2762_v47 = vld [vmem:[%s3675_s5 + $0x130] ss:$8 sps:$4 sm:$0xff]   ;;  %v2767_v49 = vld [vmem:[%s3675_s5 + $0x44] ss:$8 sps:$4 sm:$0xff]  }
 0x157   : > { %1595 = vmatprep.subr.bf16.mxu0 %v2734_v50  ;;  %v2770_v50 = vld [vmem:[%s3675_s5 + $0x144] ss:$8 sps:$4 sm:$0xff]  }
 0x159   : > { %1514 = vmatpush1.bf16.msra.mxu1 %v2729_v51  ;;  %v2765_v51 = vld [vmem:[%s3675_s5 + $0x40] ss:$8 sps:$4 sm:$0xff]  }
 0x15a   : > { %1596 = vmatpush1.bf16.msra.mxu0 %v2732_v52  ;;  %1515 = vmatprep.subr.bf16.mxu1 %v2737_v53  ;;  %v2768_v52 = vld [vmem:[%s3675_s5 + $0x140] ss:$8 sps:$4 sm:$0xff]   ;;  %v2773_v53 = vld [vmem:[%s3675_s5 + $0x54] ss:$8 sps:$4 sm:$0xff]  }
 0x15b   : > { %1597 = vmatprep.subr.bf16.mxu0 %v2740_v54  ;;  %v2776_v54 = vld [vmem:[%s3675_s5 + $0x154] ss:$8 sps:$4 sm:$0xff]  }
 0x15d   : > { %1516 = vmatpush1.bf16.msra.mxu1 %v2735_v55  ;;  %v2771_v55 = vld [vmem:[%s3675_s5 + $0x50] ss:$8 sps:$4 sm:$0xff]  }
 0x15e   : > { %1598 = vmatpush1.bf16.msra.mxu0 %v2738_v56  ;;  %2028 = vmatprep.subr.bf16.mxu1 %v2743_v57  ;;  %v2774_v56 = vld [vmem:[%s3675_s5 + $0x150] ss:$8 sps:$4 sm:$0xff]   ;;  %v2779_v57 = vld [vmem:[%s3675_s5 + $0x64] ss:$8 sps:$4 sm:$0xff]  }
 0x15f   : > { %2069 = vmatprep.subr.bf16.mxu0 %v2746_v58  ;;  %v2782_v58 = vld [vmem:[%s3675_s5 + $0x164] ss:$8 sps:$4 sm:$0xff]  }
 0x18e   : > { %v626_v4 = vpop.permute.xlu0 %625 }
 0x192   : > { %v628_v12 = vpop.permute.xlu0 %627 }
 0x193   : > { %v632_v38 = vsel %vm631_vm0, %v626_v4, %v628_v12  ;;  %v633_v14 = vsel %vm631_vm0, %v628_v12, %v626_v4  ;;  %v2792_v4 = vld [vmem:[%s3675_s5 + $0x180] ss:$8 sps:$4 sm:$0xff]  }
 0x194   : > { %v634_v17 = vsub.f32 %v3234_v46, %v633_v14  ;;  %v635_v18 = vsub.f32 %v3236_v48, %v632_v38  ;;  %v642_v25 = vsub.f32 %v3234_v46, %v632_v38  ;;  %v643_v26 = vsub.f32 %v3236_v48, %v633_v14  ;;  %v2744_v46 = vld [vmem:[%s3675_s5 + $0x100] ss:$8 sps:$4 sm:$0xff]   ;;  %v2749_v48 = vld [vmem:[%s3675_s5 + $0x14] ss:$8 sps:$4 sm:$0xff]   ;;  %v2807_v14 = vld [vmem:[%s3675_s5 + $0xb0] ss:$8 sps:$4 sm:$0xff]  }
 0x195   : > { %v2804_v12 = vld [vmem:[%s3675_s5 + $0x1a0] ss:$8 sps:$4 sm:$0xff]   ;;  %v2812_v38 = vld [vmem:[%s3675_s5 + $0x1b4] ss:$8 sps:$4 sm:$0xff]  }
 0x196   : > { %v636_v19 = vmax.f32 %v623_v16, %v634_v17  ;;  %v637_v20 = vmax.f32 %v624_v15, %v635_v18  ;;  %v2810_v15 = vld [vmem:[%s3675_s5 + $0x1b0] ss:$8 sps:$4 sm:$0xff]   ;;  %v2815_v16 = vld [vmem:[%s3675_s5 + $0xc4] ss:$8 sps:$4 sm:$0xff]   ;;  %v2813_v18 = vld [vmem:[%s3675_s5 + $0xc0] ss:$8 sps:$4 sm:$0xff]  }
 0x197   : > { %v2818_v17 = vld [vmem:[%s3675_s5 + $0x1c4] ss:$8 sps:$4 sm:$0xff]  }
 0x198   : > { %v640_v23 = vmax.f32 %v636_v19, %v638_v21  ;;  %v641_v24 = vmax.f32 %v637_v20, %v639_v22  ;;  %v2816_v19 = vld [vmem:[%s3675_s5 + $0x1c0] ss:$8 sps:$4 sm:$0xff]   ;;  %v2821_v20 = vld [vmem:[%s3675_s5 + $0xd4] ss:$8 sps:$4 sm:$0xff]   ;;  %v2819_v22 = vld [vmem:[%s3675_s5 + $0xd0] ss:$8 sps:$4 sm:$0xff]  }
 0x199   : > { %v2824_v21 = vld [vmem:[%s3675_s5 + $0x1d4] ss:$8 sps:$4 sm:$0xff]  }
 0x19a   : > { %v644_v27 = vmax.f32 %v640_v23, %v642_v25  ;;  %v645_v28 = vmax.f32 %v641_v24, %v643_v26  ;;  %v2822_v23 = vld [vmem:[%s3675_s5 + $0x1d0] ss:$8 sps:$4 sm:$0xff]   ;;  %v2827_v24 = vld [vmem:[%s3675_s5 + $0xe4] ss:$8 sps:$4 sm:$0xff]   ;;  %v2825_v26 = vld [vmem:[%s3675_s5 + $0xe0] ss:$8 sps:$4 sm:$0xff]  }
 0x19b   : > { %v2830_v25 = vld [vmem:[%s3675_s5 + $0x1e4] ss:$8 sps:$4 sm:$0xff]  }
 0x19c   : > { %648 = vst [vmem:[%s357_s21] sm:$0xff] %v644_v27  ;;  %649 = vst [vmem:[%s357_s21 + $0x8] sm:$0xff] %v645_v28  ;;  %v652_v29 = vpack.c.bf16 %v644_v27, %v644_v27  ;;  %v653_v30 = vpack.c.bf16 %v645_v28, %v645_v28  ;;  %v2828_v27 = vld [vmem:[%s3675_s5 + $0x1e0] ss:$8 sps:$4 sm:$0xff]   ;;  %v2831_v28 = vld [vmem:[%s3675_s5 + $0xf0] ss:$8 sps:$4 sm:$0xff]  }
 0x19e   : > { %1517 = vmatprep.mubr.bf16.mxu1 %v653_v30  ;;  %1599 = vmatprep.mubr.bf16.mxu0 %v653_v30  ;;  %v2834_v30 = vld [vmem:[%s3675_s5 + $0x1f0] ss:$8 sps:$4 sm:$0xff]  }
 0x19f   : > { %1518 = vmatmul.mubr.bf16.vlgmr.msra.gmra.mrb[0].mxu1 %v652_v29  ;;  %1600 = vmatmul.mubr.bf16.vlgmr.msra.gmra.mrb[4].mxu0 %v652_v29  ;;  %v2833_v29 = vld [vmem:[%s3675_s5 + $0xf4] ss:$8 sps:$4 sm:$0xff]  }
 0x1a0   : > { %2029 = vmatpush1.bf16.msra.mxu1 %v2741_v31  ;;  %2070 = vmatpush1.bf16.msra.mxu0 %v2744_v46  ;;  %v2836_v31 = vld [vmem:[%s3675_s5 + $0x1f4] ss:$8 sps:$4 sm:$0xff]   ;;  %v794_v46 = vsub.s32 2, %v3217_v39 }
 0x1a1   : > { %2030 = vmatprep.subr.bf16.mxu1 %v2749_v48  ;;  %2071 = vmatprep.subr.bf16.mxu0 %v2752_v32  ;;  %v782_v48 = vld [vmem:[%s3674_s4] sm:$0xf]  ;;  %v798_v32 = vsub.s32 3, %v3217_v39 }
 0x1a4   : > { %2031 = vmatpush1.bf16.msra.mxu1 %v2747_v33  ;;  %2072 = vmatpush1.bf16.msra.mxu0 %v2750_v34  ;;  %v787_v33 = vrot.slane %v782_v48, %v3220_v40  ;;  %v795_v34 = vrot.slane %v782_v48, %v794_v46 }
 0x1a5   : > { %2032 = vmatprep.subr.bf16.mxu1 %v2755_v35  ;;  %2073 = vmatprep.subr.bf16.mxu0 %v2758_v36  ;;  %v791_v35 = vrot.slane %v782_v48, %v3226_v42  ;;  %v799_v36 = vrot.slane %v782_v48, %v798_v32 }
 0x1a8   : > { %2033 = vmatpush1.bf16.msra.mxu1 %v2753_v37  ;;  %2074 = vmatpush1.bf16.msra.mxu0 %v2756_v41 }
 0x1a9   : > { %2034 = vmatprep.subr.bf16.mxu1 %v2761_v43  ;;  %2075 = vmatprep.subr.bf16.mxu0 %v2764_v44 }
 0x1ac   : > { %2035 = vmatpush1.bf16.msra.mxu1 %v2759_v45  ;;  %2076 = vmatpush1.bf16.msra.mxu0 %v2762_v47 }
 0x1ad   : > { %2036 = vmatprep.subr.bf16.mxu1 %v2767_v49  ;;  %2077 = vmatprep.subr.bf16.mxu0 %v2770_v50 }
 0x1b0   : > { %2037 = vmatpush1.bf16.msra.mxu1 %v2765_v51  ;;  %2078 = vmatpush1.bf16.msra.mxu0 %v2768_v52 }
 0x1b1   : > { %2038 = vmatprep.subr.bf16.mxu1 %v2773_v53  ;;  %2079 = vmatprep.subr.bf16.mxu0 %v2776_v54 }
 0x1b4   : > { %2039 = vmatpush1.bf16.msra.mxu1 %v2771_v55  ;;  %2080 = vmatpush1.bf16.msra.mxu0 %v2774_v56 }
 0x1b5   : > { %2040 = vmatprep.subr.bf16.mxu1 %v2779_v57  ;;  %2081 = vmatprep.subr.bf16.mxu0 %v2782_v58 }
 0x1b8   : > { %2041 = vmatpush1.bf16.msra.mxu1 %v2777_v59  ;;  %2082 = vmatpush1.bf16.msra.mxu0 %v2780_v60 }
 0x1b9   : > { %2042 = vmatprep.subr.bf16.mxu1 %v2785_v61  ;;  %2083 = vmatprep.subr.bf16.mxu0 %v2788_v62 }
 0x1bc   : > { %2043 = vmatpush1.bf16.msra.mxu1 %v2783_v63  ;;  %2084 = vmatpush1.bf16.msra.mxu0 %v2786_v0 }
 0x1bd   : > { %2044 = vmatprep.subr.bf16.mxu1 %v2791_v1  ;;  %2085 = vmatprep.subr.bf16.mxu0 %v2794_v2 }
 0x1c0   : > { %2045 = vmatpush1.bf16.msra.mxu1 %v2789_v3  ;;  %2086 = vmatpush1.bf16.msra.mxu0 %v2792_v4 }
 0x1c1   : > { %2046 = vmatprep.subr.bf16.mxu1 %v2797_v5  ;;  %2087 = vmatprep.subr.bf16.mxu0 %v2800_v6 }
 0x1c4   : > { %2047 = vmatpush1.bf16.msra.mxu1 %v2795_v7  ;;  %2088 = vmatpush1.bf16.msra.mxu0 %v2798_v8 }
 0x1c5   : > { %2048 = vmatprep.subr.bf16.mxu1 %v2803_v9  ;;  %2089 = vmatprep.subr.bf16.mxu0 %v2806_v10 }
 0x1c8   : > { %2049 = vmatpush1.bf16.msra.mxu1 %v2801_v11  ;;  %2090 = vmatpush1.bf16.msra.mxu0 %v2804_v12 }
 0x1c9   : > { %2050 = vmatprep.subr.bf16.mxu1 %v2809_v13  ;;  %2091 = vmatprep.subr.bf16.mxu0 %v2812_v38  ;;  %v1696_v38 = vld [vmem:[%s3676_s6] sm:$0x3] }
 0x1cc   : > { %2051 = vmatpush1.bf16.msra.mxu1 %v2807_v14  ;;  %2092 = vmatpush1.bf16.msra.mxu0 %v2810_v15  ;;  %v1701_v14 = vrot.slane %v1696_v38, %v3220_v40  ;;  %v1705_v15 = vrot.slane %v1696_v38, %v3226_v42 }
 0x1cd   : > { %2052 = vmatprep.subr.bf16.mxu1 %v2815_v16  ;;  %2093 = vmatprep.subr.bf16.mxu0 %v2818_v17 }
 0x1d0   : > { %2053 = vmatpush1.bf16.msra.mxu1 %v2813_v18  ;;  %2094 = vmatpush1.bf16.msra.mxu0 %v2816_v19 }
 0x1d1   : > { %2054 = vmatprep.subr.bf16.mxu1 %v2821_v20  ;;  %2095 = vmatprep.subr.bf16.mxu0 %v2824_v21  ;;  %v2110_v20 = vld [vmem:[%s2951_s17] sm:$0xff] }
 0x1d4   : > { %2055 = vmatpush1.bf16.msra.mxu1 %v2819_v22  ;;  %2096 = vmatpush1.bf16.msra.mxu0 %v2822_v23 }
 0x1d5   : > { %2056 = vmatprep.subr.bf16.mxu1 %v2827_v24  ;;  %2097 = vmatprep.subr.bf16.mxu0 %v2830_v25  ;;  %v2111_v25 = vld [vmem:[%s2951_s17 + $0x8] sm:$0xff] }
 0x1d8   : > { %2057 = vmatpush1.bf16.msra.mxu1 %v2825_v26  ;;  %2098 = vmatpush1.bf16.msra.mxu0 %v2828_v27 }
 0x1d9   : > { %2058 = vmatprep.subr.bf16.mxu1 %v2833_v29  ;;  %2099 = vmatprep.subr.bf16.mxu0 %v2836_v31 }
 0x1dc   : > { %2059 = vmatpush1.bf16.msra.mxu1 %v2831_v28  ;;  %2100 = vmatpush1.bf16.msra.mxu0 %v2834_v30 }
 0x272   : > { %v1519_v37 = vpop.f32.mrb[0].mxu1  ;;  %v1601_v41 = vpop.f32.mrb[4].mxu0 }
 0x273   : > { %v2480_v43 = vadd.f32 %v1519_v37, %v787_v33  ;;  %v2482_v44 = vadd.f32 %v1601_v41, %v795_v34  ;;  %v1521_v45 = vpop.f32.mrb[1].mxu1  ;;  %v1603_v47 = vpop.f32.mrb[5].mxu0 }
 0x274   : > { %v2481_v49 = vadd.f32 %v1521_v45, %v791_v35  ;;  %v2483_v50 = vadd.f32 %v1603_v47, %v799_v36  ;;  %v1523_v51 = vpop.f32.mrb[2].mxu1  ;;  %v1605_v52 = vpop.f32.mrb[6].mxu0 }
 0x275   : > { %v1612_v53 = vmul.f32 0.70710677, %v2480_v43  ;;  %v1614_v54 = vmul.f32 0.70710677, %v2482_v44  ;;  %v1524_v56 = vpop.f32.mrb[3].mxu1  ;;  %v1606_v57 = vpop.f32.mrb[7].mxu0 }
 0x276   : > { %v1613_v55 = vmul.f32 0.70710677, %v2481_v49  ;;  %v1615_v39 = vmul.f32 0.70710677, %v2483_v50  ;;  %v1608_v62 = vmul.f32 0.5, %v2480_v43  ;;  %v1610_v1 = vmul.f32 0.5, %v2482_v44 }
 0x277   : > { %2837 = verf.f32 %v1612_v53  ;;  %v1609_v2 = vmul.f32 0.5, %v2481_v49  ;;  %v1611_v5 = vmul.f32 0.5, %v2483_v50 }
 0x278   : > { %2839 = verf.f32 %v1614_v54 }
 0x279   : > { %2841 = verf.f32 %v1613_v55 }
 0x27a   : > { %2843 = verf.f32 %v1615_v39 }
 0x281   : > { %v2838_v58 = vpop.eup %2837 }
 0x282   : > { %v2840_v59 = vpop.eup %2839  ;;  %v1620_v60 = vadd.f32 1.0, %v2838_v58 }
 0x283   : > { %v2842_v61 = vpop.eup %2841  ;;  %v1622_v63 = vadd.f32 1.0, %v2840_v59 }
 0x284   : > { %v2844_v0 = vpop.eup %2843  ;;  %v1621_v3 = vadd.f32 1.0, %v2842_v61  ;;  %v1624_v4 = vmul.f32 %v1620_v60, %v1608_v62 }
 0x285   : > { %v1623_v6 = vadd.f32 1.0, %v2844_v0  ;;  %v1626_v7 = vmul.f32 %v1622_v63, %v1610_v1 }
 0x286   : > { %v1625_v8 = vmul.f32 %v1621_v3, %v1609_v2  ;;  %v1628_v11 = vpack.c.bf16 %v1624_v4, %v1624_v4 }
 0x287   : > { %v1627_v9 = vmul.f32 %v1623_v6, %v1611_v5  ;;  %v1630_v13 = vpack.c.bf16 %v1626_v7, %v1626_v7 }
 0x288   : > { %v1629_v10 = vpack.c.bf16 %v1625_v8, %v1625_v8 }
 0x289   : > { %v1631_v12 = vpack.c.bf16 %v1627_v9, %v1627_v9 }
 0x28a   : > { %2060 = vmatprep.mubr.bf16.mxu1 %v1629_v10 }
 0x28b   : > { %2101 = vmatprep.mubr.bf16.mxu0 %v1631_v12  ;;  %2061 = vmatmul.mubr.bf16.vlgmr.msra.gmra.mrb[4].mxu1 %v1628_v11 }
 0x28c   : > { %2102 = vmatmul.mubr.bf16.vlgmr.msra.gmra.mrb[8].mxu0 %v1630_v13 }
 0x35e   : > { %v2062_v16 = vpop.f32.mrb[4].mxu1 }
 0x35f   : > { %v2063_v17 = vadd.f32 %v2062_v16, %v1701_v14  ;;  %v2103_v18 = vpop.f32.mrb[8].mxu0  ;;  %v2064_v19 = vpop.f32.mrb[5].mxu1 }
 0x360   : > { %v2065_v21 = vadd.f32 %v2064_v19, %v1705_v15  ;;  %v2105_v22 = vpop.f32.mrb[9].mxu0  ;;  %v2066_v23 = vpop.f32.mrb[6].mxu1 }
 0x361   : > { %v2104_v24 = vadd.f32 %v2103_v18, %v2063_v17  ;;  %v2107_v26 = vpop.f32.mrb[10].mxu0  ;;  %v2067_v27 = vpop.f32.mrb[7].mxu1 }
 0x362   : > { %v2106_v28 = vadd.f32 %v2105_v22, %v2065_v21  ;;  %v2108_v40 = vpop.f32.mrb[11].mxu0 }
 0x363   : > { %v2112_v29 = vadd.f32 %v2110_v20, %v2104_v24 }
 0x364   : > { %v2113_v42 = vadd.f32 %v2111_v25, %v2106_v28 }
 0x365   : > { %2114 = vst [vmem:[%s347_s26] sm:$0xff] %v2112_v29 }
 0x366   : > { %2115 = vst [vmem:[%s347_s26 + $0x8] sm:$0xff] %v2113_v42 }
 0x367 PF: > { %s20_s30 = sadd.s32 1, %s2851_s30  }
 0x368   : > { %p17_p4 = scmp.ge.s32.totalorder %s20_s30, 4  }
 0x36a   :  { %19 = sbr.rel (!%p17_p4) target bundleno = 1 (0x1), region = 102 }

</bundles_post_ra>
